<compile_context>
chip_gen: v7x
topology: tpu7x:2x2x1
jax: 0.10.0
libtpu: 0.0.40
codegen_flags: <defaults>
</compile_context>

<pallas_src>
import functools
import math

import jax
import jax.numpy as jnp
from jax.experimental import pallas as pl
from jax.experimental.pallas import tpu as pltpu


def _round_up(x, m):
    return (x + m - 1) // m * m


# ----------------------------------------------------------------------------
# Pallas kernel: scaled matmul with pre-normalized operands.
#   o[b, s_tile, o_tile] = (x[b, s_tile, :] * inv_norm[b, 0, :]) @ wt[:, o_tile]
# x block: (1, ts, H); inv_norm block: (1, 1, H); wt block: (H, tn).
# sigma is already folded into wt in the wrapper.
# ----------------------------------------------------------------------------
def _cosine_linear_kernel(x_ref, inv_ref, w_ref, o_ref):
    xn = x_ref[0] * inv_ref[0]                       # (ts, H) * (1, H) -> (ts, H)
    out = jnp.dot(xn, w_ref[...], preferred_element_type=jnp.float32)  # (ts, tn)
    o_ref[0] = out.astype(o_ref.dtype)


def cosine_linear_pallas(features, weight, sigma, *, use_bf16=None):
    """features: (B, S, H) f32, weight: (O, H) f32, sigma: scalar f32 or None."""
    B, S, H = features.shape
    O = weight.shape[0]
    eps = 1e-12
    if use_bf16 is None:
        use_bf16 = H >= 512   # bf16 operand path only at real BERT sizes
    compute_dtype = jnp.bfloat16 if use_bf16 else jnp.float32

    # ---- one-time prep in plain JAX (hoisted out of the kernel) ------------
    # inverse S-axis L2 norm: 1 / max(||x||_2 over dim=1, eps)   (F.normalize dim=1)
    sumsq = jnp.sum(features * features, axis=1, keepdims=True)        # (B,1,H)
    inv_norm = jax.lax.rsqrt(jnp.maximum(sumsq, eps * eps))            # (B,1,H)

    # normalize weight rows over H, fold sigma, transpose to (H,O), pad O->O_pad
    w_sumsq = jnp.sum(weight * weight, axis=1, keepdims=True)          # (O,1)
    wn = weight * jax.lax.rsqrt(jnp.maximum(w_sumsq, eps * eps))       # (O,H)
    if sigma is not None:
        wn = jnp.asarray(sigma, jnp.float32) * wn                      # fold sigma
    O_pad = max(128, _round_up(O, 128))
    wt = jnp.zeros((H, O_pad), jnp.float32).at[:, :O].set(wn.T)        # (H,O_pad)

    # wrapper-side cast: halves HBM->VMEM bytes for the dominant x stream
    x = features.astype(compute_dtype)
    inv_norm = inv_norm.astype(compute_dtype)
    wt = wt.astype(compute_dtype)

    # ---- tiling -------------------------------------------------------------
    # S tiles up to 512 rows; guarantee >= 2 grid steps on a parallel axis
    # when B == 1 so v7x's second TensorCore has work.
    ts = min(512, _round_up(S, 8))
    S_pad = _round_up(S, ts)
    if B == 1:
        while S_pad // ts < 2 and ts > 8:
            ts = max(8, _round_up(ts // 2, 8))
            S_pad = _round_up(S, ts)
    if S_pad != S:
        x = jnp.pad(x, ((0, 0), (0, S_pad - S), (0, 0)))

    # O tiles: cap weight block at (H, 2048) so double-buffered blocks stay
    # far under v7x's VMEM even for large class counts.
    tn = min(2048, O_pad)

    grid = (B, S_pad // ts, O_pad // tn)
    out = pl.pallas_call(
        _cosine_linear_kernel,
        out_shape=jax.ShapeDtypeStruct((B, S_pad, O_pad), jnp.float32),
        grid=grid,
        in_specs=[
            pl.BlockSpec((1, ts, H), lambda b, si, oj: (b, si, 0)),   # x tile
            pl.BlockSpec((1, 1, H), lambda b, si, oj: (b, 0, 0)),     # inv S-norm
            pl.BlockSpec((H, tn), lambda b, si, oj: (0, oj)),         # weight tile
        ],
        out_specs=pl.BlockSpec((1, ts, tn), lambda b, si, oj: (b, si, oj)),
        compiler_params=pltpu.CompilerParams(
            dimension_semantics=("parallel", "parallel", "parallel"),
            vmem_limit_bytes=32 * 1024 * 1024),
    )(x, inv_norm, wt)

    return out[:, :S, :O]


# ----------------------------------------------------------------------------
# Pure-JAX reference for the classifier (for correctness check)
# ----------------------------------------------------------------------------
def cosine_linear_ref(features, weight, sigma):
    eps = 1e-12
    xn = features / jnp.maximum(
        jnp.linalg.norm(features, axis=1, keepdims=True), eps)
    wn = weight / jnp.maximum(
        jnp.linalg.norm(weight, axis=1, keepdims=True), eps)
    out = jnp.einsum('bsh,oh->bso', xn, wn)
    if sigma is not None:
        out = sigma * out
    return out


# ----------------------------------------------------------------------------
# Synthetic encoder (plain JAX glue): embedding + 1 transformer layer
# ----------------------------------------------------------------------------
def _layernorm(x, g, b, eps=1e-12):
    mu = jnp.mean(x, axis=-1, keepdims=True)
    var = jnp.var(x, axis=-1, keepdims=True)
    return (x - mu) / jnp.sqrt(var + eps) * g + b


def init_params(key, vocab, seq_len, hidden, ffn, output_dim):
    ks = jax.random.split(key, 12)
    s = 0.02
    p = {
        'tok_emb': s * jax.random.normal(ks[0], (vocab, hidden), jnp.float32),
        'pos_emb': s * jax.random.normal(ks[1], (seq_len, hidden), jnp.float32),
        'wq': s * jax.random.normal(ks[2], (hidden, hidden), jnp.float32),
        'wk': s * jax.random.normal(ks[3], (hidden, hidden), jnp.float32),
        'wv': s * jax.random.normal(ks[4], (hidden, hidden), jnp.float32),
        'wo': s * jax.random.normal(ks[5], (hidden, hidden), jnp.float32),
        'w1': s * jax.random.normal(ks[6], (hidden, ffn), jnp.float32),
        'w2': s * jax.random.normal(ks[7], (ffn, hidden), jnp.float32),
        'ln1_g': jnp.ones((hidden,), jnp.float32),
        'ln1_b': jnp.zeros((hidden,), jnp.float32),
        'ln2_g': jnp.ones((hidden,), jnp.float32),
        'ln2_b': jnp.zeros((hidden,), jnp.float32),
        'ln3_g': jnp.ones((hidden,), jnp.float32),
        'ln3_b': jnp.zeros((hidden,), jnp.float32),
    }
    # CosineLinear params: uniform(-stdv, stdv), stdv = 1/sqrt(hidden); sigma=1
    stdv = 1.0 / math.sqrt(hidden)
    p['cls_weight'] = jax.random.uniform(
        ks[8], (output_dim, hidden), jnp.float32, minval=-stdv, maxval=stdv)
    p['cls_sigma'] = jnp.ones((), jnp.float32)
    return p


def forward_encoder(params, X):
    """X: (B, S) int32 token ids -> features (B, S, H) f32."""
    h = params['tok_emb'][X] + params['pos_emb'][None, :, :]
    h = _layernorm(h, params['ln1_g'], params['ln1_b'])
    # single-head self attention
    q = h @ params['wq']
    k = h @ params['wk']
    v = h @ params['wv']
    scale = 1.0 / math.sqrt(q.shape[-1])
    att = jax.nn.softmax(jnp.einsum('bqd,bkd->bqk', q, k) * scale, axis=-1)
    h = _layernorm(h + (att @ v) @ params['wo'],
                   params['ln2_g'], params['ln2_b'])
    # feed-forward
    ff = jax.nn.gelu(h @ params['w1']) @ params['w2']
    h = _layernorm(h + ff, params['ln3_g'], params['ln3_b'])
    return h


def bert_tagger_forward(params, X, return_feat=False):
    features = forward_encoder(params, X)                       # (B, S, H)
    logits = cosine_linear_pallas(
        features, params['cls_weight'], params['cls_sigma'])    # (B, S, O)
    if return_feat:
        return logits, features
    return logits


# ----------------------------------------------------------------------------
if __name__ == "__main__":
    B, S, H, FFN, O, VOCAB = 2, 8, 32, 64, 10, 50

    key = jax.random.PRNGKey(0)
    k_param, k_tok = jax.random.split(key)
    params = init_params(k_param, VOCAB, S, H, FFN, O)
    X = jax.random.randint(k_tok, (B, S), 0, VOCAB, dtype=jnp.int32)

    logits, features = jax.jit(
        functools.partial(bert_tagger_forward, return_feat=True))(params, X)
    jax.block_until_ready(logits)

    # correctness check of the Pallas classifier vs pure-JAX reference
    ref = cosine_linear_ref(features, params['cls_weight'], params['cls_sigma'])
    use_bf16 = H >= 512   # mirrors the wrapper's default compute-dtype switch
    tol = 2e-2 if use_bf16 else 1e-5
    assert logits.shape == (B, S, O)
    assert jnp.allclose(logits, ref, atol=tol, rtol=tol), "mismatch vs reference"

    print("KERNEL_OK")
</pallas_src>

<mosaic_0001>
module attributes {stable_mosaic.version = 11 : i64} {
  func.func @_cosine_linear_kernel(%arg0: i32, %arg1: i32, %arg2: i32, %arg3: memref<1x8x32xf32, #tpu.memory_space<vmem>>, %arg4: memref<1x1x32xf32, #tpu.memory_space<vmem>>, %arg5: memref<32x128xf32, #tpu.memory_space<vmem>>, %arg6: memref<1x8x128xf32, #tpu.memory_space<vmem>>) attributes {dimension_semantics = [#tpu.dimension_semantics<parallel>, #tpu.dimension_semantics<parallel>, #tpu.dimension_semantics<parallel>], iteration_bounds = array<i64: 2, 1, 1>, scalar_prefetch = 0 : i64, scratch_operands = 0 : i64, tpu.core_type = #tpu.core_type<tc>, window_params = [{transform_indices = @transform_0, window_bounds = array<i64: 1, 8, 32>}, {transform_indices = @transform_1, window_bounds = array<i64: 1, 1, 32>}, {transform_indices = @transform_2, window_bounds = array<i64: 32, 128>}, {transform_indices = @transform_3, window_bounds = array<i64: 1, 8, 128>}]} {
    %c0 = arith.constant 0 : index
    %c0_0 = arith.constant 0 : index
    %c0_1 = arith.constant 0 : index
    %0 = vector.load %arg3[%c0, %c0_0, %c0_1] : memref<1x8x32xf32, #tpu.memory_space<vmem>>, vector<1x8x32xf32>
    %1 = vector.shape_cast %0 : vector<1x8x32xf32> to vector<8x32xf32>
    %c0_2 = arith.constant 0 : index
    %c0_3 = arith.constant 0 : index
    %c0_4 = arith.constant 0 : index
    %2 = vector.load %arg4[%c0_2, %c0_3, %c0_4] : memref<1x1x32xf32, #tpu.memory_space<vmem>>, vector<1x1x32xf32>
    %3 = vector.shape_cast %2 : vector<1x1x32xf32> to vector<1x32xf32>
    %4 = vector.broadcast %3 : vector<1x32xf32> to vector<8x32xf32>
    %5 = arith.mulf %1, %4 : vector<8x32xf32>
    %c0_5 = arith.constant 0 : index
    %c0_6 = arith.constant 0 : index
    %6 = vector.load %arg5[%c0_5, %c0_6] : memref<32x128xf32, #tpu.memory_space<vmem>>, vector<32x128xf32>
    %cst = arith.constant dense<0.000000e+00> : vector<8x128xf32>
    %7 = tpu.matmul %5, %6, %cst {dimension_numbers = #tpu.dot_dimension_numbers<[1], [0], [0], [1], [0, 0, 1, 1], [], []>} : vector<8x32xf32>, vector<32x128xf32>, vector<8x128xf32> -> vector<8x128xf32>
    %c0_7 = arith.constant 0 : index
    %c0_8 = arith.constant 0 : index
    %c0_9 = arith.constant 0 : index
    %8 = vector.load %arg6[%c0_7, %c0_8, %c0_9] : memref<1x8x128xf32, #tpu.memory_space<vmem>>, vector<1x8x128xf32>
    %9 = vector.shape_cast %8 : vector<1x8x128xf32> to vector<8x128xf32>
    %10 = vector.shape_cast %7 : vector<8x128xf32> to vector<1x8x128xf32>
    tpu.vector_store %arg6[%c0_7, %c0_8, %c0_9], %10 {strides = array<i32>} : memref<1x8x128xf32, #tpu.memory_space<vmem>>, vector<1x8x128xf32>,
    return
  }
  func.func @transform_0(%arg0: i32, %arg1: i32, %arg2: i32) -> (i32, i32, i32) {
    %c0_i32 = arith.constant 0 : i32
    %c0_i32_0 = arith.constant 0 : i32
    return %arg0, %arg1, %c0_i32 : i32, i32, i32
  }
  func.func @transform_1(%arg0: i32, %arg1: i32, %arg2: i32) -> (i32, i32, i32) {
    %c0_i32 = arith.constant 0 : i32
    %c0_i32_0 = arith.constant 0 : i32
    %c0_i32_1 = arith.constant 0 : i32
    return %arg0, %c0_i32, %c0_i32_0 : i32, i32, i32
  }
  func.func @transform_2(%arg0: i32, %arg1: i32, %arg2: i32) -> (i32, i32) {
    %c0_i32 = arith.constant 0 : i32
    %c0_i32_0 = arith.constant 0 : i32
    return %c0_i32, %arg2 : i32, i32
  }
  func.func @transform_3(%arg0: i32, %arg1: i32, %arg2: i32) -> (i32, i32, i32) {
    %c0_i32 = arith.constant 0 : i32
    return %arg0, %arg1, %arg2 : i32, i32, i32
  }
}

</mosaic_0001>

<bundles_post_ra>
// kernel: bert_tagger_forward.1
= control target key start
LH: loop header
LB: loop body
LE: loop exit
PB: predicated region body
PF: predicated region fallthrough
CT: control target
= control target key end

     0   :  { %8 = vsyncpa [#allocation3], 0  ;;  %s759_s0 = inlined_call_operand.vmem [shape: f32[2,8,32], index: 0, kind: input, shape index: {}]   ;;  %s760_s1 = inlined_call_operand.vmem [shape: f32[2,1,32], index: 1, kind: input, shape index: {}]   ;;  %s761_s2 = inlined_call_operand.vmem [shape: f32[32,128], index: 2, kind: input, shape index: {}]   ;;  %s762_s3 = inlined_call_operand.hbm [shape: f32[2,8,128], index: 3, kind: output, shape index: {}]  }
   0x1   :  { %10 = vsyncpa [#allocation3 + $0x1], 0  ;;  %s632_s12 = smov 0   ;;  %s634_s13 = smov 0  }
   0x2   :  { %s636_s14 = smov 0   ;;  %s638_s15 = smov 0  }
   0x3   :  { %s640_s16 = smov 0   ;;  %s642_s17 = smov 0  }
   0x4 LB: > { %s434_s18 = sadd.s32 4294967295, %s606_s17   ;;  %s435_s19 = sadd.s32 4294967294, %s606_s17   ;;  %s606_s17 = sphi %s642_s17, %s16_s17   ;;  %s602_s16 = sphi %s640_s16, %s769_s16   ;;  %s598_s15 = sphi %s638_s15, %s768_s15   ;;  %s594_s14 = sphi %s636_s14, %s767_s14   ;;  %s590_s13 = sphi %s634_s13, %s766_s13   ;;  %s586_s12 = sphi %s632_s12, %s765_s12  }
   0x5   : > { %s35_s20 = sadd.s32 1, %s602_s16  ;;  %s126_s21 = sadd.s32 1, %s594_s14 }
   0x6   : > { %p37_p0 = scmp.ge.s32.totalorder %s35_s20, 2  ;;  %p136_p1 = scmp.ne.s32.totalorder %s594_s14, %s590_s13 }
   0x7   : > { %p137_p2 = scmp.eq.s32.totalorder %s434_s18, 1  ;;  %p142_p3 = scmp.ne.s32.totalorder %s590_s13, %s586_s12 }
   0x8   : > { %s771_s20 = smov (%p37_p0, %s35_s20), 0  ;;  %p143_p5 = scmp.eq.s32.totalorder %s435_s19, 1 }
   0x9   : > { %p672_p4 = por %p137_p2, %p136_p1  ;;  %s119_s23 = ssub.s32 %s602_s16, %s771_s20 }
   0xa   : > { %p439_p6 = scmp.ge.s32.totalorder %s606_s17, 1  ;;  %p124_p7 = scmp.eq.s32.totalorder %s119_s23, 0 }
   0xb   : > { %p679_p8 = por %p143_p5, %p142_p3  ;;  %p184_p9 = scmp.lt.s32.totalorder %s606_s17, 3 }
   0xc   : > { %s685_s25 = scalar_select %p124_p7, %s594_s14, %s126_s21  }
   0xd   : > { %p185_p10 = pnand %p439_p6, %p184_p9 }
   0xe   : > { %v240_v0 = vld [vmem:[%s761_s2] sm:$0xff] (!%p185_p10)  ;;  %v241_v1 = vld [vmem:[%s761_s2 + $0x8] sm:$0xff] (!%p185_p10)  ;;  %v242_v2 = vld [vmem:[%s761_s2 + $0x10] sm:$0xff] (!%p185_p10)  ;;  %v608_v3 = vmov (!%p185_p10), 0.0|0.0   ;;  %vm609_vm0 = vmmov (!%p185_p10), 0   ;;  %v610_v6 = vmov (!%p185_p10), 0.0  }
   0xf   : > { %188 = sbr.rel (%p185_p10) target bundleno = 255 (0xff), region = 32  ;;  %464 = vmatprep.subr.bf16.mxu0 (!%p185_p10), %v608_v3  ;;  %v465_v4 = vpack.c.bf16 (!%p185_p10), %v241_v1, %v240_v0  ;;  %v243_v5 = vld [vmem:[%s761_s2 + $0x18] sm:$0xff] (!%p185_p10)  ;;  %461 = vmatprep.mubr.msk.f32.mxu0 (!%p185_p10), %vm609_vm0, %v610_v6  ;;  %p217_p11 = scmp.lt.s32.totalorder (!%p185_p10), %s598_s15, 1  ;;  %vm244_vm1 = vcmask (!%p185_p10), 261120  }
  0x10   : > { %v468_v7 = vpack.c.bf16 (!%p185_p10), %v243_v5, %v242_v2  ;;  %s214_s23 = sand.u32 (!%p185_p10), 1, %s590_s13   ;;  %s445_s29 = sshll.u32 (!%p185_p10), %s598_s15, 7 }
  0x11   : > { %466 = vmatpush3.bf16.msra.mxu0 (!%p185_p10), %v465_v4  ;;  %s440_s26 = sshll.u32 (!%p185_p10), %s214_s23, 3  ;;  %s714_s5 = scalar_lea.hbm (!%p185_p10), %s762_s3, %s445_s29 }
  0x12   : > { %467 = vmatprep.subr.bf16.mxu0 (!%p185_p10), %v608_v3  ;;  %s216_s27 = scalar_lea.vmem (!%p185_p10), [#allocation2], %s440_s26  ;;  %s320_s6 = scalar_lea.sflag (!%p185_p10), [#allocation3], %s214_s23 }
  0x13   : > { %s335_s28 = sshll.u32 (!%p185_p10), %s216_s27, 4  ;;  %s709_s28 = int_to_ptr.vmem [resolvable:$true] %s335_s28 }
  0x15   : > { %469 = vmatpush3.bf16.msra.mxu0 (!%p185_p10), %v468_v7 }
  0x16   : > { %s218_s7 = scalar_select %p217_p11, %s598_s15, 1 }
  0x17   : > { %s611_s15 = smov [#allocation2]  }
  0x18   : > { %s441_s8 = sshll.u32 %s218_s7, 3  ;;  %s226_s11 = scalar_lea.vmem %s760_s1, %s218_s7 }
  0x19   : > { %s223_s21 = scalar_lea.vmem %s759_s0, %s441_s8  ;;  %v442_v8 = vld [vmem:[%s226_s11] ss:$0 sm:$0xff]  ;;  %s528_s7 = scalar_lea.vmem %s709_s28, 128 }
  0x1a   : > { %v231_v9 = vld [vmem:[%s223_s21] sm:$0xff]  ;;  %p529_p12 = scmp.ne.s32.totalorder %s709_s28, %s528_s7  ;;  %s532_s8 = sshll.u32 %s611_s15, 4  ;;  %s533_s8 = int_to_ptr.vmem [resolvable:$false] %s532_s8 }
  0x1b   : > { %v239_v10 = vmul.f32 %v442_v8, %v231_v9  ;;  %s534_s9 = scalar_lea.vmem %s533_s8, 256  ;;  %p535_p1 = scmp.lt.s32.totalorder %s709_s28, %s533_s8 }
  0x1c   : > { %p530_p13 = pnand %p529_p12, %p672_p4  ;;  %p536_p2 = scmp.lt.s32.totalorder %s534_s9, %s528_s7 }
  0x1d   : > { %462 = vmatmul.mubr.msk.f32.vlgmr.msra.gmra.mrb[0].mxu0 %vm244_vm1, %v239_v10 }
  0x1e   : > { %p531_p0 = pneg %p530_p13  ;;  %p537_p3 = por %p536_p2, %p535_p1 }
  0x20   : > { %p538_p5 = pnand %p537_p3, %p531_p0 }
  0xf0   : > { %v314_v11 = vpop.f32.mrb[0].mxu0 }
  0xf1   : > { %318 = vst [vmem:[%s216_s27] sm:$0xff] %v314_v11  ;;  %v463_v12 = vpop.f32.mrb[1].mxu0 }
  0xf2   : > { %541 = shalt.err (!%p538_p5)
}
  0xf3   : > { %s542_s10 = scalar_lea.hbm %s714_s5, 128  ;;  %s546_s19 = scalar_lea.hbm %s762_s3, 256 }
  0xf4   : > { %p543_p6 = scmp.ne.s32.totalorder %s714_s5, %s542_s10  ;;  %p547_p10 = scmp.lt.u32.totalorder %s714_s5, %s762_s3 }
  0xf5   : > { %p548_p11 = scmp.lt.u32.totalorder %s546_s19, %s542_s10  ;;  %p550_p13 = scmp.lt.u32.totalorder %s542_s10, %s714_s5 }
  0xf6   : > { %p544_p7 = pnand %p543_p6, %p672_p4 }
  0xf7   : > { %p549_p12 = por %p548_p11, %p547_p10 }
  0xf8   : > { %p545_p9 = pneg %p544_p7 }
  0xf9   : > { %p551_p0 = por %p550_p13, %p549_p12 }
  0xfb   : > { %p552_p1 = pnand %p551_p0, %p545_p9 }
  0xfd   : > { %555 = shalt.err (!%p552_p1)
}
  0xfe   : > { %470 = dma.vmem_to_hbm [thread:$0]  (%p672_p4), %s709_s28, 128, %s714_s5, %s320_s6  }
  0xff PF: > { %p476_p2 = scmp.ge.s32.totalorder %s606_s17, 2  ;;  %s347_s26 = sand.u32 1, %s586_s12  }
 0x100   : > { %s348_s27 = scalar_lea.sflag [#allocation3], %s347_s26 }
 0x101   : > { %p473_p3 = pnand %p476_p2, %p679_p8 }
 0x103   : > { %581 = dma.done.wait (!%p473_p3), %s348_s27, 128  }
 0x104   : > { %583 = vsyncadd (!%p473_p3), %s348_s27, 4294967168  ;;  %s16_s17 = sadd.s32 1, %s606_s17   ;;  %s765_s12 = smov %s590_s13 }
 0x105   : > { %p13_p5 = scmp.ge.s32.totalorder %s16_s17, 4   ;;  %s766_s13 = smov %s594_s14 }
 0x106   : > { %s767_s14 = smov %s685_s25  ;;  %s768_s15 = smov %s602_s16 }
 0x107   : > { %s769_s16 = smov %s771_s20  ;;  %15 = sbr.rel (!%p13_p5) target bundleno = 4 (0x4), region = 73 }
 0x10e   :  { %353 = vsyncpa [#allocation3], 1 }
 0x10f   :  { %355 = vsyncpa [#allocation3 + $0x1], 1 }

</bundles_post_ra>
